<compile_context>
chip_gen: v7x
topology: tpu7x:2x2x1
jax: 0.10.0
libtpu: 0.0.40
codegen_flags: <defaults>
</compile_context>

<pallas_src>
import jax
import jax.numpy as jnp
from jax.experimental import pallas as pl
from jax.experimental.pallas import tpu as pltpu


# ---- synthetic constants standing in for the wizard feature-group sizes ----
NUM_FEATURES_CARDS_CONTEXT = 16      # NUMBER_FEATURES_PER_GROUP[GenericCardsContextFeatures]
NUM_FEATURES_OBJECTIVE_CONTEXT = 16  # NUMBER_FEATURES_PER_GROUP[GenericObjectiveContextFeatures]
D_IN = NUM_FEATURES_CARDS_CONTEXT + NUM_FEATURES_OBJECTIVE_CONTEXT  # 32
HIDDEN_LAYERS_SIZE = (32, 32)        # ann_specification.hidden_layers_size
NUMBER_OF_UNIQUE_CARDS = 32

LANES = 128                          # lane-dense width used everywhere in-kernel
TB = 8                               # batch-tile rows (one f32 sublane group)
H1, H2 = HIDDEN_LAYERS_SIZE
assert NUMBER_OF_UNIQUE_CARDS <= LANES
assert max(D_IN, H1, H2) <= LANES

# ---- packed-parameter slab layout (rows of a (SLAB_ROWS, 128) bf16 array) ----
W1_OFF = 0                    # rows [0 : D_IN)        : W1, real cols [0:H1)
W2_OFF = W1_OFF + D_IN        # rows [32 : 32+H1)      : W2, real cols [0:H2)
W3_OFF = W2_OFF + H1          # rows [64 : 64+H2)      : W3 output column replicated on all lanes
B1_ROW = W3_OFF + H2          # row 96                 : b1 in cols [0:H1)
B2_ROW = B1_ROW + 1           # row 97                 : b2 in cols [0:H2)
B3_ROW = B2_ROW + 1           # row 98                 : b3 replicated across all lanes
SLAB_ROWS = ((B3_ROW + 1 + 15) // 16) * 16  # 112 rows: multiple of 16 (bf16 sublane packing)


class NotSupportedNumberOfCards(Exception):
    pass


def _card_id_from_representation(card_representation: str) -> int:
    # TODO(synk): Card.from_representation(...).id requires the wizard card
    # enumeration; use a deterministic stand-in hash into the card id space.
    return sum(ord(c) for c in card_representation) % NUMBER_OF_UNIQUE_CARDS


# ----------------------- one-time parameter packing --------------------------
def pack_params(params):
    """Pack (w1,b1,w2,b2,w3,b3) into one lane-dense (SLAB_ROWS, 128) bf16 slab."""
    w1, b1, w2, b2, w3, b3 = params
    slab = jnp.zeros((SLAB_ROWS, LANES), jnp.bfloat16)
    slab = slab.at[W1_OFF:W1_OFF + D_IN, 0:H1].set(w1.astype(jnp.bfloat16))
    slab = slab.at[W2_OFF:W2_OFF + H1, 0:H2].set(w2.astype(jnp.bfloat16))
    # Replicate the (H2, 1) output column across all 128 lanes so the kernel's
    # final matmul yields the scalar broadcast across a full vreg row.
    slab = slab.at[W3_OFF:W3_OFF + H2, :].set(
        jnp.broadcast_to(w3.astype(jnp.bfloat16), (H2, LANES)))
    slab = slab.at[B1_ROW, 0:H1].set(b1.astype(jnp.bfloat16))
    slab = slab.at[B2_ROW, 0:H2].set(b2.astype(jnp.bfloat16))
    slab = slab.at[B3_ROW, :].set(jnp.broadcast_to(b3.astype(jnp.bfloat16), (LANES,)))
    return slab


# --------------------------- Pallas kernel ----------------------------------
def _base_ann_kernel(cid_ref,   # VMEM (TB, 1)        int32  per-row card id
                     x_ref,     # VMEM (TB, 128)      f32    lanes >= D_IN are zero
                     p_ref,     # VMEM (SLAB_ROWS,128) bf16  packed params (grid-resident)
                     out_ref):  # VMEM (TB, 128)      f32
    w1 = p_ref[W1_OFF:W1_OFF + D_IN, :]                      # (32, 128) bf16
    w2 = p_ref[W2_OFF:W2_OFF + H1, :]                        # (32, 128) bf16
    w3 = p_ref[W3_OFF:W3_OFF + H2, :]                        # (32, 128) bf16, col replicated
    b1 = p_ref[B1_ROW:B1_ROW + 1, :].astype(jnp.float32)     # (1, 128)
    b2 = p_ref[B2_ROW:B2_ROW + 1, :].astype(jnp.float32)     # (1, 128)
    b3 = p_ref[B3_ROW:B3_ROW + 1, :].astype(jnp.float32)     # (1, 128), replicated

    # Contract over the real K each time; bf16 operands, f32 accumulation.
    x = x_ref[:, :D_IN].astype(jnp.bfloat16)                 # (TB, 32)
    h = jnp.dot(x, w1, preferred_element_type=jnp.float32) + b1
    h = jnp.maximum(h, 0.0)                                  # (TB, 128) f32
    h = jnp.dot(h[:, :H1].astype(jnp.bfloat16), w2,
                preferred_element_type=jnp.float32) + b2
    h = jnp.maximum(h, 0.0)                                  # (TB, 128) f32
    y = jnp.dot(h[:, :H2].astype(jnp.bfloat16), w3,
                preferred_element_type=jnp.float32) + b3     # (TB, 128): scalar in every lane

    # one-hot scatter: pure lane-iota select, scalar never leaves the vregs
    lane = jax.lax.broadcasted_iota(jnp.int32, (TB, LANES), 1)
    cid = cid_ref[...]                                       # (TB, 1) int32
    out_ref[...] = jnp.where(lane == cid, y, jnp.float32(0.0))


# --------------------------- batched forward ---------------------------------
def _batched_forward(card_ids, x, param_slab):
    """card_ids: (B,) int32, x: (B, D_IN) f32 -> (B, NUMBER_OF_UNIQUE_CARDS) f32."""
    B = x.shape[0]
    Bp = pl.cdiv(B, TB) * TB

    # lane-dense padded input and a per-row card-id column
    x_pad = jnp.zeros((Bp, LANES), jnp.float32).at[:B, :D_IN].set(x.astype(jnp.float32))
    cid_col = jnp.zeros((Bp, 1), jnp.int32).at[:B, 0].set(card_ids.astype(jnp.int32))

    flops = 2 * Bp * LANES * (D_IN + H1 + H2)
    bytes_accessed = (SLAB_ROWS * LANES * 2          # bf16 param slab
                      + Bp * LANES * 4               # x
                      + Bp * 4                       # card ids
                      + Bp * LANES * 4)              # out

    out = pl.pallas_call(
        _base_ann_kernel,
        out_shape=jax.ShapeDtypeStruct((Bp, LANES), jnp.float32),
        grid_spec=pltpu.PrefetchScalarGridSpec(
            num_scalar_prefetch=0,
            grid=(Bp // TB,),
            in_specs=[
                pl.BlockSpec((TB, 1), lambda i: (i, 0)),             # card ids
                pl.BlockSpec((TB, LANES), lambda i: (i, 0)),         # x tile
                pl.BlockSpec((SLAB_ROWS, LANES), lambda i: (0, 0)),  # slab, resident
            ],
            out_specs=pl.BlockSpec((TB, LANES), lambda i: (i, 0)),
        ),
        compiler_params=pltpu.CompilerParams(
            dimension_semantics=("parallel",)),
        cost_estimate=pl.CostEstimate(flops=flops, transcendentals=0,
                                      bytes_accessed=bytes_accessed),
    )(cid_col, x_pad, param_slab)
    return out[:B, :NUMBER_OF_UNIQUE_CARDS]


_batched_forward_jit = jax.jit(_batched_forward)


@jax.jit
def _forward_single_jit(card_id, hand_features, strategy_features, param_slab):
    x = jnp.concatenate((hand_features, strategy_features)).astype(jnp.float32)
    x = x.reshape(1, D_IN)
    return _batched_forward(card_id, x, param_slab)[0]


def base_ann_forward(cards_features: dict, hand_features, strategy_features, param_slab):
    """Mirrors BaseANN.forward (single-sample)."""
    if len(list(cards_features.keys())) > 1:
        raise NotSupportedNumberOfCards
    card_representation = next(iter(cards_features))
    card_id = jnp.array([_card_id_from_representation(card_representation)], dtype=jnp.int32)
    return _forward_single_jit(card_id, hand_features, strategy_features, param_slab)


# ----------------------- deterministic parameter init -----------------------
def init_params(key):
    h1, h2 = HIDDEN_LAYERS_SIZE
    ks = jax.random.split(key, 6)

    def linear(kw, kb, fan_in, fan_out):
        bound = 1.0 / jnp.sqrt(fan_in)
        w = jax.random.uniform(kw, (fan_in, fan_out), jnp.float32, -bound, bound)
        b = jax.random.uniform(kb, (fan_out,), jnp.float32, -bound, bound)
        return w, b

    w1, b1 = linear(ks[0], ks[1], D_IN, h1)
    w2, b2 = linear(ks[2], ks[3], h1, h2)
    w3, b3 = linear(ks[4], ks[5], h2, 1)
    return (w1, b1, w2, b2, w3, b3)


def _ref_mlp(x, params):
    """Plain-JAX f32 reference; x: (B, D_IN) -> (B,) scalars."""
    w1, b1, w2, b2, w3, b3 = params
    h = jnp.maximum(x @ w1 + b1, 0.0)
    h = jnp.maximum(h @ w2 + b2, 0.0)
    return (h @ w3 + b3)[:, 0]


# --------------------------------- main --------------------------------------
if __name__ == "__main__":
    key = jax.random.PRNGKey(0)
    k_params, k_hand, k_strat, k_batch, k_cids = jax.random.split(key, 5)

    params = init_params(k_params)
    param_slab = jax.block_until_ready(pack_params(params))   # packed once, off the hot path

    # ---- single-sample path (mirrors BaseANN.forward) ----
    hand_features = jax.random.normal(k_hand, (NUM_FEATURES_CARDS_CONTEXT,), jnp.float32)
    strategy_features = jax.random.normal(k_strat, (NUM_FEATURES_OBJECTIVE_CONTEXT,), jnp.float32)
    cards_features = {"R7": jnp.zeros((4,), jnp.float32)}  # values unused, as in BaseANN

    out = base_ann_forward(cards_features, hand_features, strategy_features, param_slab)
    out = jax.block_until_ready(out)

    x = jnp.concatenate((hand_features, strategy_features)).reshape(1, D_IN)
    scalar = _ref_mlp(x, params)[0]
    cid = _card_id_from_representation("R7")
    ref = jnp.zeros(NUMBER_OF_UNIQUE_CARDS, jnp.float32).at[cid].set(scalar)
    assert out.shape == (NUMBER_OF_UNIQUE_CARDS,)
    # bf16 weights -> looser tolerance than the pure-f32 version
    assert jnp.allclose(out, ref, atol=5e-2, rtol=5e-2), (out, ref)

    # ---- batched path (grid over batch, "parallel" dimension semantics) ----
    B = 16
    xb = jax.random.normal(k_batch, (B, D_IN), jnp.float32)
    cids = jax.random.randint(k_cids, (B,), 0, NUMBER_OF_UNIQUE_CARDS, dtype=jnp.int32)
    outb = jax.block_until_ready(_batched_forward_jit(cids, xb, param_slab))
    scalars = _ref_mlp(xb, params)
    refb = jnp.zeros((B, NUMBER_OF_UNIQUE_CARDS), jnp.float32).at[
        jnp.arange(B), cids].set(scalars)
    assert outb.shape == (B, NUMBER_OF_UNIQUE_CARDS)
    assert jnp.allclose(outb, refb, atol=5e-2, rtol=5e-2), (outb, refb)

    print("KERNEL_OK")
</pallas_src>

<mosaic_0001>
module attributes {stable_mosaic.version = 11 : i64} {
  func.func @_base_ann_kernel(%arg0: i32, %arg1: memref<8x1xi32, #tpu.memory_space<vmem>>, %arg2: memref<8x128xf32, #tpu.memory_space<vmem>>, %arg3: memref<112x128xbf16, #tpu.memory_space<vmem>>, %arg4: memref<8x128xf32, #tpu.memory_space<vmem>>) attributes {dimension_semantics = [#tpu.dimension_semantics<parallel>], iteration_bounds = array<i64: 1>, scalar_prefetch = 0 : i64, scratch_operands = 0 : i64, tpu.core_type = #tpu.core_type<tc>, window_params = [{transform_indices = @transform_0, window_bounds = array<i64: 8, 1>}, {transform_indices = @transform_1, window_bounds = array<i64: 8, 128>}, {pipeline_mode = #tpu.pipeline_mode<synchronous>, transform_indices = @transform_2, window_bounds = array<i64: 112, 128>}, {transform_indices = @transform_3, window_bounds = array<i64: 8, 128>}]} {
    %c0 = arith.constant 0 : index
    %c0_0 = arith.constant 0 : index
    %0 = vector.load %arg3[%c0, %c0_0] : memref<112x128xbf16, #tpu.memory_space<vmem>>, vector<32x128xbf16>
    %c32 = arith.constant 32 : index
    %c0_1 = arith.constant 0 : index
    %1 = vector.load %arg3[%c32, %c0_1] : memref<112x128xbf16, #tpu.memory_space<vmem>>, vector<32x128xbf16>
    %c64 = arith.constant 64 : index
    %c0_2 = arith.constant 0 : index
    %2 = vector.load %arg3[%c64, %c0_2] : memref<112x128xbf16, #tpu.memory_space<vmem>>, vector<32x128xbf16>
    %c96 = arith.constant 96 : index
    %c0_3 = arith.constant 0 : index
    %3 = vector.load %arg3[%c96, %c0_3] : memref<112x128xbf16, #tpu.memory_space<vmem>>, vector<1x128xbf16>
    %4 = arith.extf %3 : vector<1x128xbf16> to vector<1x128xf32>
    %c97 = arith.constant 97 : index
    %c0_4 = arith.constant 0 : index
    %5 = vector.load %arg3[%c97, %c0_4] : memref<112x128xbf16, #tpu.memory_space<vmem>>, vector<1x128xbf16>
    %6 = arith.extf %5 : vector<1x128xbf16> to vector<1x128xf32>
    %c98 = arith.constant 98 : index
    %c0_5 = arith.constant 0 : index
    %7 = vector.load %arg3[%c98, %c0_5] : memref<112x128xbf16, #tpu.memory_space<vmem>>, vector<1x128xbf16>
    %8 = arith.extf %7 : vector<1x128xbf16> to vector<1x128xf32>
    %c0_6 = arith.constant 0 : index
    %c0_7 = arith.constant 0 : index
    %9 = vector.load %arg2[%c0_6, %c0_7] : memref<8x128xf32, #tpu.memory_space<vmem>>, vector<8x32xf32>
    %10 = arith.truncf %9 : vector<8x32xf32> to vector<8x32xbf16>
    %cst = arith.constant dense<0.000000e+00> : vector<8x128xf32>
    %11 = tpu.matmul %10, %0, %cst {dimension_numbers = #tpu.dot_dimension_numbers<[1], [0], [0], [1], [0, 0, 1, 1], [], []>} : vector<8x32xbf16>, vector<32x128xbf16>, vector<8x128xf32> -> vector<8x128xf32>
    %12 = vector.broadcast %4 : vector<1x128xf32> to vector<8x128xf32>
    %13 = arith.addf %11, %12 : vector<8x128xf32>
    %cst_8 = arith.constant 0.000000e+00 : f32
    %14 = vector.broadcast %cst_8 : f32 to vector<8x128xf32>
    %15 = arith.maximumf %13, %14 : vector<8x128xf32>
    %16 = vector.extract_strided_slice %15 {offsets = [0, 0], sizes = [8, 32], strides = [1, 1]} : vector<8x128xf32> to vector<8x32xf32>
    %17 = arith.truncf %16 : vector<8x32xf32> to vector<8x32xbf16>
    %cst_9 = arith.constant dense<0.000000e+00> : vector<8x128xf32>
    %18 = tpu.matmul %17, %1, %cst_9 {dimension_numbers = #tpu.dot_dimension_numbers<[1], [0], [0], [1], [0, 0, 1, 1], [], []>} : vector<8x32xbf16>, vector<32x128xbf16>, vector<8x128xf32> -> vector<8x128xf32>
    %19 = vector.broadcast %6 : vector<1x128xf32> to vector<8x128xf32>
    %20 = arith.addf %18, %19 : vector<8x128xf32>
    %cst_10 = arith.constant 0.000000e+00 : f32
    %21 = vector.broadcast %cst_10 : f32 to vector<8x128xf32>
    %22 = arith.maximumf %20, %21 : vector<8x128xf32>
    %23 = vector.extract_strided_slice %22 {offsets = [0, 0], sizes = [8, 32], strides = [1, 1]} : vector<8x128xf32> to vector<8x32xf32>
    %24 = arith.truncf %23 : vector<8x32xf32> to vector<8x32xbf16>
    %cst_11 = arith.constant dense<0.000000e+00> : vector<8x128xf32>
    %25 = tpu.matmul %24, %2, %cst_11 {dimension_numbers = #tpu.dot_dimension_numbers<[1], [0], [0], [1], [0, 0, 1, 1], [], []>} : vector<8x32xbf16>, vector<32x128xbf16>, vector<8x128xf32> -> vector<8x128xf32>
    %26 = vector.broadcast %8 : vector<1x128xf32> to vector<8x128xf32>
    %27 = arith.addf %25, %26 : vector<8x128xf32>
    %28 = tpu.iota {dimensions = array<i32: 1>} : vector<8x128xi32>
    %c0_12 = arith.constant 0 : index
    %c0_13 = arith.constant 0 : index
    %29 = vector.load %arg1[%c0_12, %c0_13] : memref<8x1xi32, #tpu.memory_space<vmem>>, vector<8x1xi32>
    %30 = vector.broadcast %29 : vector<8x1xi32> to vector<8x128xi32>
    %31 = arith.cmpi eq, %28, %30 : vector<8x128xi32>
    %cst_14 = arith.constant 0.000000e+00 : f32
    %32 = vector.broadcast %cst_14 : f32 to vector<8x128xf32>
    %33 = arith.select %31, %27, %32 : vector<8x128xi1>, vector<8x128xf32>
    %c0_15 = arith.constant 0 : index
    %c0_16 = arith.constant 0 : index
    %34 = vector.load %arg4[%c0_15, %c0_16] : memref<8x128xf32, #tpu.memory_space<vmem>>, vector<8x128xf32>
    tpu.vector_store %arg4[%c0_15, %c0_16], %33 {strides = array<i32>} : memref<8x128xf32, #tpu.memory_space<vmem>>, vector<8x128xf32>,
    return
  }
  func.func @transform_0(%arg0: i32) -> (i32, i32) {
    %c0_i32 = arith.constant 0 : i32
    %c0_i32_0 = arith.constant 0 : i32
    return %arg0, %c0_i32 : i32, i32
  }
  func.func @transform_1(%arg0: i32) -> (i32, i32) {
    %c0_i32 = arith.constant 0 : i32
    %c0_i32_0 = arith.constant 0 : i32
    return %arg0, %c0_i32 : i32, i32
  }
  func.func @transform_2(%arg0: i32) -> (i32, i32) {
    %c0_i32 = arith.constant 0 : i32
    %c0_i32_0 = arith.constant 0 : i32
    %c0_i32_1 = arith.constant 0 : i32
    return %c0_i32, %c0_i32_0 : i32, i32
  }
  func.func @transform_3(%arg0: i32) -> (i32, i32) {
    %c0_i32 = arith.constant 0 : i32
    %c0_i32_0 = arith.constant 0 : i32
    return %arg0, %c0_i32 : i32, i32
  }
}

</mosaic_0001>

<bundles_post_ra>
// kernel: _forward_single_jit.1
= control target key start
LH: loop header
LB: loop body
LE: loop exit
PB: predicated region body
PF: predicated region fallthrough
CT: control target
= control target key end

     0   :  { %8 = vsyncpa [#allocation3], 0  ;;  %s322_s12 = smov [#allocation2]   ;;  %s372_s0 = inlined_call_operand.vmem [shape: s32[8,1], index: 0, kind: input, shape index: {}]   ;;  %s373_s1 = inlined_call_operand.vmem [shape: f32[8,128], index: 1, kind: input, shape index: {}]   ;;  %s374_s2 = inlined_call_operand.hbm [shape: bf16[112,128], index: 2, kind: input, shape index: {}]   ;;  %s375_s3 = inlined_call_operand.vmem [shape: f32[8,128], index: 3, kind: output, shape index: {}]  }
   0x1   :  { %s18_s13 = sshll.u32 %s322_s12, 4  ;;  %s298_s16 = scalar_lea.hbm %s374_s2, 896  ;;  %s19_s13 = int_to_ptr.vmem [resolvable:$true] %s18_s13 }
   0x2   :  { %p299_p0 = scmp.ne.s32.totalorder %s374_s2, %s298_s16  ;;  %p302_p1 = scmp.lt.u32.totalorder %s298_s16, %s374_s2 }
   0x4   :  { %p304_p2 = pnand %p302_p1, %p299_p0 }
   0x6   :  { %307 = shalt.err (!%p304_p2)
}
   0x7   :  { %s308_s21 = scalar_lea.vmem %s19_s13, 896  ;;  %p313_p4 = scmp.lt.s32.totalorder %s19_s13, %s19_s13 }
   0x8   :  { %p309_p3 = scmp.ne.s32.totalorder %s19_s13, %s308_s21  ;;  %p314_p5 = scmp.lt.s32.totalorder %s308_s21, %s308_s21 }
   0xa   :  { %p315_p6 = por %p314_p5, %p313_p4 }
   0xc   :  { %p316_p7 = pnand %p315_p6, %p309_p3 }
   0xe   :  { %319 = shalt.err (!%p316_p7)
}
   0xf   :  { %s323_s22 = smov 64   ;;  %s324_s23 = smov 4  }
  0x10   :  { %24 = dma.hbm_to_vmem [thread:$0]  %s374_s2, 896, %s19_s13, [#allocation3], %s323_s22, %s323_s22, %s324_s23  }
  0x11   :  { %320 = dma.done.wait [#allocation3], 896  }
  0x12   :  { %321 = vsyncadd [#allocation3], 4294966400  ;;  %v325_v0 = vmov 0.0   ;;  %vm326_vm0 = vmmov 0   ;;  %v292_v1 = vld [vmem:[#allocation2] sm:$0xff]   ;;  %v293_v2 = vld [vmem:[#allocation2 + $0x8] sm:$0xff]   ;;  %v47_v8 = vlaneseq }
  0x13   :  { %261 = vmatprep.subr.bf16.mxu0 %v325_v0  ;;  %265 = vmatprep.mubr.msk.bf16.mxu0 %vm326_vm0, %v325_v0  ;;  %v45_v3 = vld [vmem:[%s373_s1] sm:$0xff]  ;;  %vm63_vm1 = vcmask 261120   ;;  %v294_v5 = vld [vmem:[#allocation2 + $0x10] sm:$0xff]   ;;  %v295_v6 = vld [vmem:[#allocation2 + $0x18] sm:$0xff]   ;;  %v327_v23 = vmov 0  }
  0x14   :  { %269 = vmatprep.subr.bf16.mxu1 %v325_v0  ;;  %273 = vmatprep.mubr.msk.bf16.mxu1 %vm326_vm0, %v325_v0  ;;  %v46_v4 = vpack.c.bf16 %v45_v3, %v45_v3  ;;  %v296_v7 = vld [vmem:[#allocation2 + $0x20] sm:$0xff]   ;;  %v48_v9 = vshrl.u32 %v47_v8, 7  ;;  %v41_v10 = vld [vmem:[#allocation2 + $0x30] sm:$0x1]  ;;  %v297_v21 = vld [vmem:[#allocation2 + $0x28] sm:$0xff]   ;;  %v230_v36 = vand.u32 127, %v47_v8 }
  0x15   :  { %262 = vmatpush3.bf16.msra.mxu0 %v292_v1  ;;  %270 = vmatpush3.bf16.msra.mxu1 %v294_v5  ;;  %v42_v11 = vunpack.c.l.bf16 %v41_v10  ;;  %v231_v22 = vld [vmem:[%s372_s0] sm:$0xff]  ;;  %v43_v33 = vld [vmem:[#allocation2 + $0x30] sm:$0x2] }
  0x16   :  { %263 = vmatprep.subr.bf16.mxu0 %v325_v0  ;;  %271 = vmatprep.subr.bf16.mxu1 %v325_v0  ;;  %v49_v12 = vsub.s32 0, %v48_v9  ;;  %v111_v24 = vsub.s32 1, %v48_v9  ;;  %v44_v34 = vunpack.c.l.bf16 %v43_v33  ;;  %v172_v35 = vsub.s32 2, %v48_v9 }
  0x17   :  { %291 = vset.pattern.permute.xlu0 %v327_v23 }
  0x18   :  { %v50_v13 = vrot.slane %v42_v11, %v49_v12  ;;  %233 = vperm.xlu0 %291, %v231_v22   ;;  %v112_v25 = vrot.slane %v42_v11, %v111_v24  ;;  %v173_v37 = vrot.slane %v44_v34, %v172_v35 }
  0x19   :  { %264 = vmatpush3.bf16.msra.mxu0 %v293_v2  ;;  %272 = vmatpush3.bf16.msra.mxu1 %v295_v6 }
  0x1a   :  { %277 = vmatprep.subr.bf16.mxu0 %v325_v0 }
  0x1c   :  { %266 = vmatmul.mubr.msk.bf16.vlgmr.msra.gmra.mrb[0].mxu0 %vm63_vm1, %v46_v4 }
  0x1d   :  { %281 = vmatprep.mubr.msk.bf16.mxu0 %vm326_vm0, %v325_v0  ;;  %278 = vmatpush3.bf16.msra.mxu0 %v296_v7 }
  0x1e   :  { %279 = vmatprep.subr.bf16.mxu0 %v325_v0 }
  0x21   :  { %280 = vmatpush3.bf16.msra.mxu0 %v297_v21 }
  0x97   :  { %v234_v38 = vpop.permute.xlu0 %233 }
  0x98   :  { %vm235_vm2 = vcmp.eq.s32.totalorder %v230_v36, %v234_v38 }
  0xef   :  { %v101_v14 = vpop.f32.mrb[0].mxu0 }
  0xf0   :  { %v102_v15 = vadd.f32 %v101_v14, %v50_v13  ;;  %v267_v16 = vpop.f32.mrb[1].mxu0 }
  0xf1   :  { %v104_v17 = vpop.f32.mrb[2].mxu0 }
  0xf2   :  { %v107_v18 = vmax.f32 %v102_v15, 0.0  ;;  %v268_v19 = vpop.f32.mrb[3].mxu0 }
  0xf4   :  { %v108_v20 = vpack.c.bf16 %v107_v18, %v107_v18 }
  0xf6   :  { %274 = vmatmul.mubr.msk.bf16.vlgmr.msra.gmra.mrb[0].mxu1 %vm63_vm1, %v108_v20 }
 0x1c9   :  { %v162_v26 = vpop.f32.mrb[0].mxu1 }
 0x1ca   :  { %v163_v27 = vadd.f32 %v162_v26, %v112_v25  ;;  %v275_v28 = vpop.f32.mrb[1].mxu1 }
 0x1cb   :  { %v165_v29 = vpop.f32.mrb[2].mxu1 }
 0x1cc   :  { %v168_v30 = vmax.f32 %v163_v27, 0.0  ;;  %v276_v31 = vpop.f32.mrb[3].mxu1 }
 0x1ce   :  { %v169_v32 = vpack.c.bf16 %v168_v30, %v168_v30 }
 0x1d0   :  { %282 = vmatmul.mubr.msk.bf16.vlgmr.msra.gmra.mrb[4].mxu0 %vm63_vm1, %v169_v32 }
 0x2a3   :  { %v223_v39 = vpop.f32.mrb[4].mxu0 }
 0x2a4   :  { %v224_v40 = vadd.f32 %v223_v39, %v173_v37  ;;  %v283_v41 = vpop.f32.mrb[5].mxu0 }
 0x2a5   :  { %v226_v42 = vpop.f32.mrb[6].mxu0 }
 0x2a6   :  { %v236_v43 = vsel %vm235_vm2, %v224_v40, 0.0  ;;  %v284_v44 = vpop.f32.mrb[7].mxu0 }
 0x2a7   :  { %237 = vst [vmem:[%s375_s3] sm:$0xff] %v236_v43 }
 0x2a8   :  { %242 = vsyncpa [#allocation3], 1 }

</bundles_post_ra>
